<compile_context>
chip_gen: v7x
topology: tpu7x:2x2x1
jax: 0.10.0
libtpu: 0.0.40
codegen_flags: <defaults>
</compile_context>

<pallas_src>
import functools

import jax
import jax.numpy as jnp
from jax import lax
from jax.experimental import pallas as pl
from jax.experimental.pallas import tpu as pltpu

LANES = 128
SUBLANES = 8
MAX_ROW_TILE = 2048  # (2048,128) f32 = 1 MiB per buffer per input


def _round_up(x, m):
    return -(-x // m) * m


def _wbce_kernel(x_ref, t_ref, out_ref, acc_pos, acc_neg, *,
                 total, row_tile, w_p, w_n, eps):
    i = pl.program_id(0)
    nsteps = pl.num_programs(0)

    @pl.when(i == 0)
    def _init():
        acc_pos[...] = jnp.zeros_like(acc_pos)
        acc_neg[...] = jnp.zeros_like(acc_neg)

    x = x_ref[...].astype(jnp.float32)
    t = t_ref[...].astype(jnp.float32)

    def accumulate(valid):
        # w_p / w_n are factored out of the mean (applied once in the epilogue).
        p = t * jnp.log(x + eps)
        n = (1.0 - t) * jnp.log((1.0 - x) + eps)
        if valid is not None:
            p = jnp.where(valid, p, 0.0)
            n = jnp.where(valid, n, 0.0)
        # Pure-VPU fold to the (8,128) vector accumulators; the cross-lane
        # reduction happens only once, in the epilogue.
        acc_pos[...] += jnp.sum(p.reshape(row_tile // SUBLANES, SUBLANES, LANES), axis=0)
        acc_neg[...] += jnp.sum(n.reshape(row_tile // SUBLANES, SUBLANES, LANES), axis=0)

    # Static (trace-time) decision: masking is only required if the grid reads
    # past the logical element count (ragged last tile / reshape tail pad).
    needs_mask = (total % (row_tile * LANES)) != 0
    if needs_mask:
        last = nsteps - 1

        @pl.when(i < last)
        def _full_tiles():
            accumulate(None)

        @pl.when(i == last)
        def _ragged_tile():
            rid = lax.broadcasted_iota(jnp.int32, (row_tile, LANES), 0)
            lid = lax.broadcasted_iota(jnp.int32, (row_tile, LANES), 1)
            gidx = (i * row_tile + rid) * LANES + lid
            accumulate(gidx < total)
    else:
        accumulate(None)

    @pl.when(i == nsteps - 1)
    def _epilogue():
        inv_n = 1.0 / total  # static constant, no scalar input / in-kernel divide
        s_pos = jnp.sum(acc_pos[...], keepdims=True)  # (1,1)
        s_neg = jnp.sum(acc_neg[...], keepdims=True)  # (1,1)
        out_ref[...] = (-w_p * inv_n) * s_pos + (-w_n * inv_n) * s_neg


def weight_bce_loss(inputs, targets, *, w_p=1.0, w_n=5.0, epsilon=1e-07):
    """JAX/Pallas equivalent of WeightBCELoss.forward. Returns the scalar loss."""
    assert inputs.shape == targets.shape
    total = int(inputs.size)

    # Keep native dtypes in HBM; the kernel casts tiles to f32 after load.
    x = inputs.reshape(-1)
    t = targets.reshape(-1)

    # Lane-dense 2-D slab. Only the (<128-element) tail needed for the reshape
    # is padded; ragged row tiles are handled by the in-kernel mask instead of
    # a full-array pad copy.
    rows = pl.cdiv(total, LANES)
    pad = rows * LANES - total
    if pad:
        x = jnp.pad(x, (0, pad))
        t = jnp.pad(t, (0, pad))
    x2d = x.reshape(rows, LANES)
    t2d = t.reshape(rows, LANES)

    row_tile = min(MAX_ROW_TILE, _round_up(rows, SUBLANES))
    grid = (pl.cdiv(rows, row_tile),)

    kernel = functools.partial(
        _wbce_kernel, total=total, row_tile=row_tile,
        w_p=float(w_p), w_n=float(w_n), eps=float(epsilon))

    # TODO(synk): on v7x (2 TCs/chip) add a leading size-2 "parallel" grid axis
    # with per-core partial sums combined in the wrapper for up to ~2x.
    out = pl.pallas_call(
        kernel,
        out_shape=jax.ShapeDtypeStruct((1, 1), jnp.float32),
        grid_spec=pltpu.PrefetchScalarGridSpec(
            num_scalar_prefetch=0,
            grid=grid,
            in_specs=[
                pl.BlockSpec((row_tile, LANES), lambda i: (i, 0)),
                pl.BlockSpec((row_tile, LANES), lambda i: (i, 0)),
            ],
            out_specs=pl.BlockSpec((1, 1), lambda i: (0, 0)),
            scratch_shapes=[
                pltpu.VMEM((SUBLANES, LANES), jnp.float32),
                pltpu.VMEM((SUBLANES, LANES), jnp.float32),
            ],
        ),
        compiler_params=pltpu.CompilerParams(
            dimension_semantics=("arbitrary",),
        ),
    )(x2d, t2d)
    return out[0, 0]


def _reference(inputs, targets, w_p=1.0, w_n=5.0, eps=1e-07):
    loss_pos = -1.0 * jnp.mean(w_p * targets * jnp.log(inputs + eps))
    loss_neg = -1.0 * jnp.mean(w_n * (1.0 - targets) * jnp.log(1.0 - inputs + eps))
    return loss_pos + loss_neg


if __name__ == "__main__":
    key = jax.random.PRNGKey(0)
    k1, k2 = jax.random.split(key)

    # NCHW probabilities in (0,1) and binary targets, small shapes.
    shape = (2, 4, 16, 16)
    inputs = jax.random.uniform(k1, shape, dtype=jnp.float32, minval=0.01, maxval=0.99)
    targets = (jax.random.uniform(k2, shape) > 0.5).astype(jnp.float32)

    loss = weight_bce_loss(inputs, targets)
    jax.block_until_ready(loss)
    ref = _reference(inputs, targets)
    assert jnp.allclose(loss, ref, atol=1e-5, rtol=1e-4), (loss, ref)

    # Non-128-aligned total: exercises the tail-pad + ragged-tile masked path.
    shape2 = (3, 5, 7)
    inputs2 = jax.random.uniform(k1, shape2, dtype=jnp.float32, minval=0.01, maxval=0.99)
    targets2 = (jax.random.uniform(k2, shape2) > 0.5).astype(jnp.float32)
    loss2 = weight_bce_loss(inputs2, targets2)
    jax.block_until_ready(loss2)
    ref2 = _reference(inputs2, targets2)
    assert jnp.allclose(loss2, ref2, atol=1e-5, rtol=1e-4), (loss2, ref2)

    print("KERNEL_OK")
</pallas_src>

<mosaic_0001>
module attributes {stable_mosaic.version = 11 : i64} {
  func.func @_wbce_kernel(%arg0: i32, %arg1: memref<16x128xf32, #tpu.memory_space<vmem>>, %arg2: memref<16x128xf32, #tpu.memory_space<vmem>>, %arg3: memref<1x1xf32, #tpu.memory_space<vmem>>, %arg4: memref<8x128xf32, #tpu.memory_space<vmem>>, %arg5: memref<8x128xf32, #tpu.memory_space<vmem>>) attributes {dimension_semantics = [#tpu.dimension_semantics<arbitrary>], iteration_bounds = array<i64: 1>, scalar_prefetch = 0 : i64, scratch_operands = 2 : i64, tpu.core_type = #tpu.core_type<tc>, window_params = [{transform_indices = @transform_0, window_bounds = array<i64: 16, 128>}, {transform_indices = @transform_1, window_bounds = array<i64: 16, 128>}, {pipeline_mode = #tpu.pipeline_mode<synchronous>, transform_indices = @transform_2, window_bounds = array<i64: 1, 1>}]} {
    %c0_i32 = arith.constant 0 : i32
    %0 = arith.cmpi eq, %arg0, %c0_i32 : i32
    %1 = arith.extui %0 : i1 to i32
    %c0_i32_0 = arith.constant 0 : i32
    %2 = arith.cmpi ne, %1, %c0_i32_0 : i32
    scf.if %2 {
      %cst_19 = arith.constant 0.000000e+00 : f32
      %30 = vector.broadcast %cst_19 : f32 to vector<8x128xf32>
      %c0_20 = arith.constant 0 : index
      %c0_21 = arith.constant 0 : index
      %31 = vector.load %arg4[%c0_20, %c0_21] : memref<8x128xf32, #tpu.memory_space<vmem>>, vector<8x128xf32>
      tpu.vector_store %arg4[%c0_20, %c0_21], %30 {strides = array<i32>} : memref<8x128xf32, #tpu.memory_space<vmem>>, vector<8x128xf32>,
      %cst_22 = arith.constant 0.000000e+00 : f32
      %32 = vector.broadcast %cst_22 : f32 to vector<8x128xf32>
      %c0_23 = arith.constant 0 : index
      %c0_24 = arith.constant 0 : index
      %33 = vector.load %arg5[%c0_23, %c0_24] : memref<8x128xf32, #tpu.memory_space<vmem>>, vector<8x128xf32>
      tpu.vector_store %arg5[%c0_23, %c0_24], %32 {strides = array<i32>} : memref<8x128xf32, #tpu.memory_space<vmem>>, vector<8x128xf32>,
    } else {
    }
    %c0 = arith.constant 0 : index
    %c0_1 = arith.constant 0 : index
    %3 = vector.load %arg1[%c0, %c0_1] : memref<16x128xf32, #tpu.memory_space<vmem>>, vector<16x128xf32>
    %c0_2 = arith.constant 0 : index
    %c0_3 = arith.constant 0 : index
    %4 = vector.load %arg2[%c0_2, %c0_3] : memref<16x128xf32, #tpu.memory_space<vmem>>, vector<16x128xf32>
    %cst = arith.constant 1.000000e-07 : f32
    %5 = vector.broadcast %cst : f32 to vector<16x128xf32>
    %6 = arith.addf %3, %5 : vector<16x128xf32>
    %7 = math.log %6 : vector<16x128xf32>
    %8 = arith.mulf %4, %7 : vector<16x128xf32>
    %cst_4 = arith.constant 1.000000e+00 : f32
    %9 = vector.broadcast %cst_4 : f32 to vector<16x128xf32>
    %10 = arith.subf %9, %4 : vector<16x128xf32>
    %cst_5 = arith.constant 1.000000e+00 : f32
    %11 = vector.broadcast %cst_5 : f32 to vector<16x128xf32>
    %12 = arith.subf %11, %3 : vector<16x128xf32>
    %cst_6 = arith.constant 1.000000e-07 : f32
    %13 = vector.broadcast %cst_6 : f32 to vector<16x128xf32>
    %14 = arith.addf %12, %13 : vector<16x128xf32>
    %15 = math.log %14 : vector<16x128xf32>
    %16 = arith.mulf %10, %15 : vector<16x128xf32>
    %c0_7 = arith.constant 0 : index
    %c0_8 = arith.constant 0 : index
    %17 = vector.load %arg4[%c0_7, %c0_8] : memref<8x128xf32, #tpu.memory_space<vmem>>, vector<8x128xf32>
    %18 = vector.shape_cast %8 : vector<16x128xf32> to vector<2x8x128xf32>
    %cst_9 = arith.constant dense<0.000000e+00> : vector<8x128xf32>
    %19 = vector.multi_reduction <add>, %18, %cst_9 [0] : vector<2x8x128xf32> to vector<8x128xf32>
    %20 = arith.addf %17, %19 : vector<8x128xf32>
    %c0_10 = arith.constant 0 : index
    %c0_11 = arith.constant 0 : index
    %21 = vector.load %arg4[%c0_10, %c0_11] : memref<8x128xf32, #tpu.memory_space<vmem>>, vector<8x128xf32>
    tpu.vector_store %arg4[%c0_10, %c0_11], %20 {strides = array<i32>} : memref<8x128xf32, #tpu.memory_space<vmem>>, vector<8x128xf32>,
    %c0_12 = arith.constant 0 : index
    %c0_13 = arith.constant 0 : index
    %22 = vector.load %arg5[%c0_12, %c0_13] : memref<8x128xf32, #tpu.memory_space<vmem>>, vector<8x128xf32>
    %23 = vector.shape_cast %16 : vector<16x128xf32> to vector<2x8x128xf32>
    %cst_14 = arith.constant dense<0.000000e+00> : vector<8x128xf32>
    %24 = vector.multi_reduction <add>, %23, %cst_14 [0] : vector<2x8x128xf32> to vector<8x128xf32>
    %25 = arith.addf %22, %24 : vector<8x128xf32>
    %c0_15 = arith.constant 0 : index
    %c0_16 = arith.constant 0 : index
    %26 = vector.load %arg5[%c0_15, %c0_16] : memref<8x128xf32, #tpu.memory_space<vmem>>, vector<8x128xf32>
    tpu.vector_store %arg5[%c0_15, %c0_16], %25 {strides = array<i32>} : memref<8x128xf32, #tpu.memory_space<vmem>>, vector<8x128xf32>,
    %c0_i32_17 = arith.constant 0 : i32
    %27 = arith.cmpi eq, %arg0, %c0_i32_17 : i32
    %28 = arith.extui %27 : i1 to i32
    %c0_i32_18 = arith.constant 0 : i32
    %29 = arith.cmpi ne, %28, %c0_i32_18 : i32
    scf.if %29 {
      %c0_19 = arith.constant 0 : index
      %c0_20 = arith.constant 0 : index
      %30 = vector.load %arg4[%c0_19, %c0_20] : memref<8x128xf32, #tpu.memory_space<vmem>>, vector<8x128xf32>
      %31 = vector.shape_cast %30 : vector<8x128xf32> to vector<1x8x128xf32>
      %cst_21 = arith.constant dense<0.000000e+00> : vector<1xf32>
      %32 = vector.multi_reduction <add>, %31, %cst_21 [1, 2] : vector<1x8x128xf32> to vector<1xf32>
      %33 = vector.shape_cast %32 : vector<1xf32> to vector<1x1x1xf32>
      %34 = vector.extract %33[0, 0, 0] : f32 from vector<1x1x1xf32>
      %35 = vector.broadcast %34 : f32 to vector<1x1xf32>
      %c0_22 = arith.constant 0 : index
      %c0_23 = arith.constant 0 : index
      %36 = vector.load %arg5[%c0_22, %c0_23] : memref<8x128xf32, #tpu.memory_space<vmem>>, vector<8x128xf32>
      %37 = vector.shape_cast %36 : vector<8x128xf32> to vector<1x8x128xf32>
      %cst_24 = arith.constant dense<0.000000e+00> : vector<1xf32>
      %38 = vector.multi_reduction <add>, %37, %cst_24 [1, 2] : vector<1x8x128xf32> to vector<1xf32>
      %39 = vector.shape_cast %38 : vector<1xf32> to vector<1x1x1xf32>
      %40 = vector.extract %39[0, 0, 0] : f32 from vector<1x1x1xf32>
      %41 = vector.broadcast %40 : f32 to vector<1x1xf32>
      %cst_25 = arith.constant -4.8828125E-4 : f32
      %42 = vector.broadcast %cst_25 : f32 to vector<1x1xf32>
      %43 = arith.mulf %42, %35 : vector<1x1xf32>
      %cst_26 = arith.constant -0.00244140625 : f32
      %44 = vector.broadcast %cst_26 : f32 to vector<1x1xf32>
      %45 = arith.mulf %44, %41 : vector<1x1xf32>
      %46 = arith.addf %43, %45 : vector<1x1xf32>
      %c0_27 = arith.constant 0 : index
      %c0_28 = arith.constant 0 : index
      %47 = vector.load %arg3[%c0_27, %c0_28] : memref<1x1xf32, #tpu.memory_space<vmem>>, vector<1x1xf32>
      tpu.vector_store %arg3[%c0_27, %c0_28], %46 {strides = array<i32>} : memref<1x1xf32, #tpu.memory_space<vmem>>, vector<1x1xf32>,
    } else {
    }
    return
  }
  func.func @transform_0(%arg0: i32) -> (i32, i32) {
    %c0_i32 = arith.constant 0 : i32
    %c0_i32_0 = arith.constant 0 : i32
    return %arg0, %c0_i32 : i32, i32
  }
  func.func @transform_1(%arg0: i32) -> (i32, i32) {
    %c0_i32 = arith.constant 0 : i32
    %c0_i32_0 = arith.constant 0 : i32
    return %arg0, %c0_i32 : i32, i32
  }
  func.func @transform_2(%arg0: i32) -> (i32, i32) {
    %c0_i32 = arith.constant 0 : i32
    %c0_i32_0 = arith.constant 0 : i32
    %c0_i32_1 = arith.constant 0 : i32
    return %c0_i32, %c0_i32_0 : i32, i32
  }
}

</mosaic_0001>

<bundles_post_ra>
// kernel: tpu_custom_call.1
= control target key start
LH: loop header
LB: loop body
LE: loop exit
PB: predicated region body
PF: predicated region fallthrough
CT: control target
= control target key end

     0   :  { %7 = vsyncpa [#allocation5], 0  ;;  %s269_s0 = inlined_call_operand.hbm [shape: f32[16,128], index: 0, kind: input, shape index: {}]   ;;  %s270_s1 = inlined_call_operand.hbm [shape: f32[16,128], index: 1, kind: input, shape index: {}]   ;;  %s271_s2 = inlined_call_operand.hbm [shape: f32[1,1], index: 2, kind: output, shape index: {}]  }
   0x1   :  { %8 = vsyncpa [#allocation8], 0 }
   0x2   :  { %9 = vsyncpa [#allocation6], 0  ;;  %s213_s9 = smov [#allocation4]   ;;  %s141_s13 = scalar_lea.hbm %s269_s0, 256 }
   0x3   :  { %s15_s10 = sshll.u32 %s213_s9, 4  ;;  %p142_p0 = scmp.ne.s32.totalorder %s269_s0, %s141_s13  ;;  %s16_s10 = int_to_ptr.vmem [resolvable:$true] %s15_s10 }
   0x4   :  { %p145_p1 = scmp.lt.u32.totalorder %s141_s13, %s269_s0 }
   0x6   :  { %p147_p2 = pnand %p145_p1, %p142_p0 }
   0x8   :  { %150 = shalt.err (!%p147_p2)
}
   0x9   :  { %s151_s18 = scalar_lea.vmem %s16_s10, 256  ;;  %p156_p4 = scmp.lt.s32.totalorder %s16_s10, %s16_s10 }
   0xa   :  { %p152_p3 = scmp.ne.s32.totalorder %s16_s10, %s151_s18  ;;  %p157_p5 = scmp.lt.s32.totalorder %s151_s18, %s151_s18 }
   0xc   :  { %p158_p6 = por %p157_p5, %p156_p4 }
   0xe   :  { %p159_p7 = pnand %p158_p6, %p152_p3 }
  0x10   :  { %162 = shalt.err (!%p159_p7)
}
  0x11   :  { %s214_s19 = smov 128   ;;  %s215_s20 = smov 8  }
  0x12   :  { %21 = dma.hbm_to_vmem [thread:$0]  %s269_s0, 256, %s16_s10, [#allocation5], %s214_s19, %s214_s19, %s215_s20  }
  0x13   :  { %s216_s23 = smov [#allocation7]   ;;  %s163_s27 = scalar_lea.hbm %s270_s1, 256 }
  0x14   :  { %s27_s24 = sshll.u32 %s216_s23, 4  ;;  %p164_p8 = scmp.ne.s32.totalorder %s270_s1, %s163_s27  ;;  %s28_s24 = int_to_ptr.vmem [resolvable:$true] %s27_s24 }
  0x15   :  { %p167_p9 = scmp.lt.u32.totalorder %s163_s27, %s270_s1 }
  0x17   :  { %p169_p10 = pnand %p167_p9, %p164_p8 }
  0x19   :  { %172 = shalt.err (!%p169_p10)
}
  0x1a   :  { %s173_s4 = scalar_lea.vmem %s28_s24, 256  ;;  %p178_p12 = scmp.lt.s32.totalorder %s28_s24, %s28_s24 }
  0x1b   :  { %p174_p11 = scmp.ne.s32.totalorder %s28_s24, %s173_s4  ;;  %p179_p13 = scmp.lt.s32.totalorder %s173_s4, %s173_s4 }
  0x1d   :  { %p180_p0 = por %p179_p13, %p178_p12 }
  0x1f   :  { %p181_p1 = pnand %p180_p0, %p174_p11 }
  0x21   :  { %184 = shalt.err (!%p181_p1)
}
  0x22   :  { %33 = dma.hbm_to_vmem [thread:$0]  %s270_s1, 256, %s28_s24, [#allocation8], %s214_s19, %s214_s19, %s215_s20  }
  0x23   :  { %207 = dma.done.wait [#allocation5], 256  }
  0x24   :  { %208 = vsyncadd [#allocation5], 4294967040 }
  0x25   :  { %209 = dma.done.wait [#allocation8], 256  }
  0x26   :  { %210 = vsyncadd [#allocation8], 4294967040  ;;  %v46_v0 = vld [vmem:[#allocation4] sm:$0xff]  ;;  %v47_v1 = vld [vmem:[#allocation4 + $0x8] sm:$0xff]  ;;  %s217_s7 = smov [#allocation9]   ;;  %vm106_vm0 = vcmask 0  }
  0x27   :  { %v50_v2 = vadd.f32 1e-07, %v46_v0  ;;  %v51_v3 = vadd.f32 1e-07, %v47_v1  ;;  %v60_v4 = vsub.f32 1.0, %v46_v0  ;;  %v61_v5 = vsub.f32 1.0, %v47_v1 }
  0x28   :  { %v48_v9 = vld [vmem:[#allocation7] sm:$0xff]  ;;  %v49_v11 = vld [vmem:[#allocation7 + $0x8] sm:$0xff]  ;;  %s114_s8 = sshll.u32 %s217_s7, 4  ;;  %s115_s8 = int_to_ptr.vmem [resolvable:$true] %s114_s8 }
  0x29   :  { %133 = vlog2.f32 %v50_v2  ;;  %v62_v6 = vadd.f32 1e-07, %v60_v4  ;;  %v63_v7 = vadd.f32 1e-07, %v61_v5  ;;  %v58_v14 = vsub.f32 1.0, %v48_v9  ;;  %s185_s9 = scalar_lea.vmem %s115_s8, 16  ;;  %p190_p3 = scmp.lt.s32.totalorder %s115_s8, %s115_s8 }
  0x2a   :  { %135 = vlog2.f32 %v51_v3  ;;  %v59_v17 = vsub.f32 1.0, %v49_v11  ;;  %p186_p2 = scmp.ne.s32.totalorder %s115_s8, %s185_s9  ;;  %s189_s10 = scalar_lea.vmem %s115_s8, 32 }
  0x2b   :  { %137 = vlog2.f32 %v62_v6  ;;  %p191_p4 = scmp.lt.s32.totalorder %s189_s10, %s185_s9 }
  0x2c   :  { %139 = vlog2.f32 %v63_v7 }
  0x2d   :  { %p192_p5 = por %p191_p4, %p190_p3 }
  0x2f   :  { %p193_p6 = pnand %p192_p5, %p186_p2 }
  0x33   :  { %v134_v8 = vpop.eup %133 }
  0x34   :  { %v136_v10 = vpop.eup %135  ;;  %v53_v12 = vmul.f32 0.6931472, %v134_v8 }
  0x35   :  { %v55_v13 = vmul.f32 0.6931472, %v136_v10  ;;  %v138_v15 = vpop.eup %137 }
  0x36   :  { %v56_v16 = vmul.f32 %v53_v12, %v48_v9  ;;  %v140_v18 = vpop.eup %139  ;;  %v65_v20 = vmul.f32 0.6931472, %v138_v15 }
  0x37   :  { %v57_v19 = vmul.f32 %v55_v13, %v49_v11  ;;  %v67_v21 = vmul.f32 0.6931472, %v140_v18 }
  0x38   :  { %v68_v23 = vmul.f32 %v65_v20, %v58_v14 }
  0x39   :  { %v71_v22 = vadd.f32 %v57_v19, %v56_v16  ;;  %v69_v24 = vmul.f32 %v67_v21, %v59_v17 }
  0x3b   :  { %82 = vadd.xlane.f32.xlu0 %v71_v22  ;;  %v75_v25 = vadd.f32 %v69_v24, %v68_v23 }
  0x3f   :  { %93 = vadd.xlane.f32.xlu0 %v75_v25 }
  0xc8   :  { %v83_v26 = vpop.xlane.xlu0 %82 }
  0xc9   :  { %v84_v27 = vrot.slane %v83_v26, 4 }
  0xcb   :  { %v85_v28 = vadd.f32 %v84_v27, %v83_v26 }
  0xcc   :  { %v94_v29 = vpop.xlane.xlu0 %93 }
  0xcd   :  { %v86_v30 = vrot.slane %v85_v28, 2  ;;  %v95_v31 = vrot.slane %v94_v29, 4 }
  0xcf   :  { %v96_v32 = vadd.f32 %v95_v31, %v94_v29  ;;  %v87_v33 = vadd.f32 %v86_v30, %v85_v28 }
  0xd1   :  { %v97_v34 = vrot.slane %v96_v32, 2  ;;  %v88_v35 = vrot.slane %v87_v33, 1 }
  0xd3   :  { %v98_v36 = vadd.f32 %v97_v34, %v96_v32  ;;  %v89_v37 = vadd.f32 %v88_v35, %v87_v33 }
  0xd5   :  { %124 = vpush %v89_v37  ;;  %v99_v38 = vrot.slane %v98_v36, 1 }
  0xd7   :  { %v100_v39 = vadd.f32 %v99_v38, %v98_v36 }
  0xd9   :  { %126 = vpush %v100_v39 }
 0x106   :  { %s125_s1 = spop %124 }
 0x107   :  { %v91_v40 = vstv %s125_s1 }
 0x108   :  { %v103_v42 = vmul.f32 -0.00048828125, %v91_v40 }
 0x10a   :  { %s127_s6 = spop %126 }
 0x10b   :  { %v102_v41 = vstv %s127_s6 }
 0x10c   :  { %v104_v43 = vmul.f32 -0.0024414063, %v102_v41 }
 0x10e   :  { %v105_v44 = vadd.f32 %v104_v43, %v103_v42 }
 0x110   :  { %107 = vst.msk [vmem:[#allocation9] sm:$0x1] %vm106_vm0, %v105_v44 }
 0x111   :  { %196 = shalt.err (!%p193_p6)
}
 0x112   :  { %s197_s13 = scalar_lea.hbm %s271_s2, 16 }
 0x113   :  { %p198_p7 = scmp.ne.s32.totalorder %s271_s2, %s197_s13  ;;  %p201_p8 = scmp.lt.u32.totalorder %s197_s13, %s271_s2 }
 0x115   :  { %p203_p9 = pnand %p201_p8, %p198_p7 }
 0x117   :  { %206 = shalt.err (!%p203_p9)
}
 0x118   :  { %117 = dma.vmem_to_hbm [thread:$0]  %s115_s8, 16, %s271_s2, [#allocation6]  }
 0x119   :  { %211 = dma.done.wait [#allocation6], 16  }
 0x11a   :  { %212 = vsyncadd [#allocation6], 4294967280 }
 0x11b   :  { %121 = vsyncpa [#allocation5], 1 }
 0x11c   :  { %122 = vsyncpa [#allocation8], 1 }
 0x11d   :  { %123 = vsyncpa [#allocation6], 1 }

</bundles_post_ra>
